<compile_context>
chip_gen: v7x
topology: tpu7x:2x2x1
jax: 0.10.0
libtpu: 0.0.40
codegen_flags: <defaults>
</compile_context>

<pallas_src>
import functools

import jax
import jax.numpy as jnp
from jax import lax
from jax.experimental import pallas as pl
from jax.experimental.pallas import tpu as pltpu


def _round_up(x, m):
    return ((x + m - 1) // m) * m


def _patch_proj_kernel(x_ref, w_ref, b_ref, o_ref):
    # x_ref: (TM, K)     patch tile (compute dtype, e.g. bf16)
    # w_ref: (K, N_pad)  flattened conv weight, VMEM-resident across the grid
    # b_ref: (1, N_pad)  bias (f32), VMEM-resident across the grid
    # o_ref: (TM, N_pad) output tile (out dtype, bf16 by default)
    acc = jnp.dot(x_ref[...], w_ref[...], preferred_element_type=jnp.float32)
    # bias add in f32; the dtype cast is the very last op (keeps the add on
    # the f32 VPU path on v5e, which has no bf16 VALU).
    o_ref[...] = (acc + b_ref[...]).astype(o_ref.dtype)


def patch_embed_forward(x, weight, bias, patch_size, *,
                        compute_dtype=jnp.bfloat16,
                        out_dtype=None,
                        tile_m=1024):
    """PatchEmbed forward (Conv2d with kernel_size == stride == patch_size).

    x: (B, C, H, W); weight: (embed_dim, C, P, P); bias: (embed_dim,).
    Returns (B, embed_dim, H//P, W//P), matching the PyTorch module.

    NOTE: compute_dtype / out_dtype default to bfloat16 (f32 MXU accumulation,
    f32 bias add, final cast to out_dtype).  Pass compute_dtype=out_dtype=
    jnp.float32 for bit-closer parity with the f32 PyTorch Conv2d.
    """
    B, C, H, W = x.shape
    P = patch_size
    N = weight.shape[0]          # embed_dim
    nH, nW = H // P, W // P
    M = B * nH * nW
    K = C * P * P
    if out_dtype is None:
        out_dtype = compute_dtype

    # --- glue: extract non-overlapping patches in (C, P, P) order -> (M, K) ---
    # Cast first so the gather pass writes compute_dtype bytes (usually bf16).
    # TODO(synk): the NCHW->patch gather stays in XLA; fusing it would need a
    # (B, nH) strip grid with an in-VMEM transpose, skipped here for robustness.
    xp = x.astype(compute_dtype).reshape(B, C, nH, P, nW, P)
    xp = jnp.transpose(xp, (0, 2, 4, 1, 3, 5)).reshape(M, K)

    # --- glue: conv weight -> (K, N) matching the (C, P, P) flattening order ---
    w2d = weight.astype(compute_dtype).reshape(N, K).T

    # Lane-dense padding of the embed axis only (multiple of 128 -> unmasked
    # vector stores).  M is left ragged; Pallas masks the final partial tile.
    N_pad = _round_up(N, 128)
    if N_pad != N:
        w2d = jnp.pad(w2d, ((0, 0), (0, N_pad - N)))
        b2d = jnp.pad(bias.astype(jnp.float32), (0, N_pad - N)).reshape(1, N_pad)
    else:
        b2d = bias.astype(jnp.float32).reshape(1, N_pad)

    # TM: full M if it fits, else a multiple of 8 (block-shape legality).
    TM = M if M <= tile_m else (tile_m // 8) * 8
    grid = (pl.cdiv(M, TM),)

    in_itemsize = jnp.dtype(compute_dtype).itemsize
    out_itemsize = jnp.dtype(out_dtype).itemsize
    cost = pl.CostEstimate(
        flops=2 * M * K * N_pad,
        transcendentals=0,
        bytes_accessed=(M * K + K * N_pad) * in_itemsize
        + M * N_pad * out_itemsize + N_pad * 4,
    )

    out2d = pl.pallas_call(
        _patch_proj_kernel,
        out_shape=jax.ShapeDtypeStruct((M, N_pad), out_dtype),
        grid_spec=pltpu.PrefetchScalarGridSpec(
            num_scalar_prefetch=0,
            grid=grid,
            in_specs=[
                pl.BlockSpec((TM, K), lambda i: (i, 0)),        # patches (streamed)
                pl.BlockSpec((K, N_pad), lambda i: (0, 0)),     # weight (resident)
                pl.BlockSpec((1, N_pad), lambda i: (0, 0)),     # bias   (resident)
            ],
            out_specs=pl.BlockSpec((TM, N_pad), lambda i: (i, 0)),
        ),
        compiler_params=pltpu.CompilerParams(
            # single M axis marked parallel -> megacore sharding on v7x;
            # footprint ~few MiB even at TM=1024, safe on v7x's 64 MiB VMEM.
            dimension_semantics=("parallel",),
            vmem_limit_bytes=32 * 1024 * 1024,
        ),
        cost_estimate=cost,
    )(xp, w2d, b2d)

    out2d = out2d[:, :N]         # no-op when embed_dim is already 128-aligned
    # Token-major (B, nH*nW, N) would skip this transpose entirely; we return
    # NCHW to match the PyTorch module's forward exactly.
    out = out2d.reshape(B, nH, nW, N).transpose(0, 3, 1, 2)
    return out


if __name__ == "__main__":
    # Small shapes consistent with the module: img_size=16, patch_size=8,
    # in_chans=3, embed_dim=32, batch=2.
    B, C, H, W = 2, 3, 16, 16
    P = 8
    EMBED = 32

    key = jax.random.PRNGKey(0)
    kx, kw, kb = jax.random.split(key, 3)
    x = jax.random.normal(kx, (B, C, H, W), dtype=jnp.float32)
    fan_in = C * P * P
    weight = jax.random.normal(kw, (EMBED, C, P, P), dtype=jnp.float32) / jnp.sqrt(fan_in)
    bias = jax.random.normal(kb, (EMBED,), dtype=jnp.float32) * 0.01

    fwd = jax.jit(functools.partial(patch_embed_forward, patch_size=P))
    out = jax.block_until_ready(fwd(x, weight, bias))
    assert out.shape == (B, EMBED, H // P, W // P), out.shape
    out_f32 = out.astype(jnp.float32)

    # Tight check: exact f32 conv on the same bf16-rounded inputs (isolates the
    # kernel's tiling/indexing correctness; remaining delta is only the final
    # bf16 output rounding).
    xb = x.astype(jnp.bfloat16).astype(jnp.float32)
    wb = weight.astype(jnp.bfloat16).astype(jnp.float32)
    ref_bf16_in = lax.conv_general_dilated(
        xb, wb, window_strides=(P, P), padding="VALID",
        dimension_numbers=("NCHW", "OIHW", "NCHW"),
        precision=lax.Precision.HIGHEST,
    ) + bias.reshape(1, EMBED, 1, 1)
    assert jnp.allclose(out_f32, ref_bf16_in, atol=3e-2, rtol=3e-2), \
        float(jnp.abs(out_f32 - ref_bf16_in).max())

    # Loose sanity check vs the full-f32 conv (difference is bf16 input +
    # output rounding only).
    ref_f32 = lax.conv_general_dilated(
        x, weight, window_strides=(P, P), padding="VALID",
        dimension_numbers=("NCHW", "OIHW", "NCHW"),
        precision=lax.Precision.HIGHEST,
    ) + bias.reshape(1, EMBED, 1, 1)
    assert jnp.allclose(out_f32, ref_f32, atol=6e-2, rtol=6e-2), \
        float(jnp.abs(out_f32 - ref_f32).max())

    # Full-f32 path check (compute_dtype=out_dtype=f32) for strict parity.
    fwd_f32 = jax.jit(functools.partial(
        patch_embed_forward, patch_size=P,
        compute_dtype=jnp.float32, out_dtype=jnp.float32))
    out_strict = jax.block_until_ready(fwd_f32(x, weight, bias))
    assert jnp.allclose(out_strict, ref_f32, atol=1e-4, rtol=1e-4), \
        float(jnp.abs(out_strict - ref_f32).max())

    print("KERNEL_OK")
</pallas_src>

<mosaic_0001>
module attributes {stable_mosaic.version = 11 : i64} {
  func.func @_patch_proj_kernel(%arg0: i32, %arg1: memref<8x192xbf16, #tpu.memory_space<vmem>>, %arg2: memref<192x128xbf16, #tpu.memory_space<vmem>>, %arg3: memref<1x128xf32, #tpu.memory_space<vmem>>, %arg4: memref<8x128xbf16, #tpu.memory_space<vmem>>) attributes {dimension_semantics = [#tpu.dimension_semantics<parallel>], iteration_bounds = array<i64: 1>, scalar_prefetch = 0 : i64, scratch_operands = 0 : i64, tpu.core_type = #tpu.core_type<tc>, window_params = [{transform_indices = @transform_0, window_bounds = array<i64: 8, 192>}, {pipeline_mode = #tpu.pipeline_mode<synchronous>, transform_indices = @transform_1, window_bounds = array<i64: 192, 128>}, {pipeline_mode = #tpu.pipeline_mode<synchronous>, transform_indices = @transform_2, window_bounds = array<i64: 1, 128>}, {transform_indices = @transform_3, window_bounds = array<i64: 8, 128>}]} {
    %c0 = arith.constant 0 : index
    %c0_0 = arith.constant 0 : index
    %0 = vector.load %arg1[%c0, %c0_0] : memref<8x192xbf16, #tpu.memory_space<vmem>>, vector<8x192xbf16>
    %c0_1 = arith.constant 0 : index
    %c0_2 = arith.constant 0 : index
    %1 = vector.load %arg2[%c0_1, %c0_2] : memref<192x128xbf16, #tpu.memory_space<vmem>>, vector<192x128xbf16>
    %cst = arith.constant dense<0.000000e+00> : vector<8x128xf32>
    %2 = tpu.matmul %0, %1, %cst {dimension_numbers = #tpu.dot_dimension_numbers<[1], [0], [0], [1], [0, 0, 1, 1], [], []>} : vector<8x192xbf16>, vector<192x128xbf16>, vector<8x128xf32> -> vector<8x128xf32>
    %c0_3 = arith.constant 0 : index
    %c0_4 = arith.constant 0 : index
    %3 = vector.load %arg3[%c0_3, %c0_4] : memref<1x128xf32, #tpu.memory_space<vmem>>, vector<1x128xf32>
    %4 = vector.broadcast %3 : vector<1x128xf32> to vector<8x128xf32>
    %5 = arith.addf %2, %4 : vector<8x128xf32>
    %6 = arith.truncf %5 : vector<8x128xf32> to vector<8x128xbf16>
    %c0_5 = arith.constant 0 : index
    %c0_6 = arith.constant 0 : index
    %7 = vector.load %arg4[%c0_5, %c0_6] : memref<8x128xbf16, #tpu.memory_space<vmem>>, vector<8x128xbf16>
    tpu.vector_store %arg4[%c0_5, %c0_6], %6 {strides = array<i32>} : memref<8x128xbf16, #tpu.memory_space<vmem>>, vector<8x128xbf16>,
    return
  }
  func.func @transform_0(%arg0: i32) -> (i32, i32) {
    %c0_i32 = arith.constant 0 : i32
    %c0_i32_0 = arith.constant 0 : i32
    return %arg0, %c0_i32 : i32, i32
  }
  func.func @transform_1(%arg0: i32) -> (i32, i32) {
    %c0_i32 = arith.constant 0 : i32
    %c0_i32_0 = arith.constant 0 : i32
    %c0_i32_1 = arith.constant 0 : i32
    return %c0_i32, %c0_i32_0 : i32, i32
  }
  func.func @transform_2(%arg0: i32) -> (i32, i32) {
    %c0_i32 = arith.constant 0 : i32
    %c0_i32_0 = arith.constant 0 : i32
    %c0_i32_1 = arith.constant 0 : i32
    return %c0_i32, %c0_i32_0 : i32, i32
  }
  func.func @transform_3(%arg0: i32) -> (i32, i32) {
    %c0_i32 = arith.constant 0 : i32
    %c0_i32_0 = arith.constant 0 : i32
    return %arg0, %c0_i32 : i32, i32
  }
}

</mosaic_0001>

<bundles_post_ra>
// kernel: patch_embed_forward.1
= control target key start
LH: loop header
LB: loop body
LE: loop exit
PB: predicated region body
PF: predicated region fallthrough
CT: control target
= control target key end

     0   :  { %v242_v1 = vmov 0   ;;  %vm126_vm0 = vcmask 523264   ;;  %s318_s0 = inlined_call_operand.vmem [shape: bf16[8,192], index: 0, kind: input, shape index: {}]   ;;  %s319_s1 = inlined_call_operand.vmem [shape: bf16[192,128], index: 1, kind: input, shape index: {}]   ;;  %s320_s2 = inlined_call_operand.vmem [shape: f32[1,128], index: 2, kind: input, shape index: {}]   ;;  %s321_s3 = inlined_call_operand.hbm [shape: bf16[8,128], index: 3, kind: output, shape index: {}]  }
   0x1   :  { %v204_v0 = vld [vmem:[%s319_s1] sm:$0xff]   ;;  %130 = vmatprep.subr.bf16.mxu0 %v242_v1  ;;  %v205_v2 = vld [vmem:[%s319_s1 + $0x8] sm:$0xff]   ;;  %v206_v3 = vld [vmem:[%s319_s1 + $0x10] sm:$0xff]  }
   0x2   :  { %131 = vmatpush1.bf16.msra.mxu0 %v204_v0  ;;  %v207_v4 = vld [vmem:[%s319_s1 + $0x18] sm:$0xff]   ;;  %v16_v5 = vld [vmem:[%s318_s0] sm:$0xff] }
   0x3   :  { %132 = vmatprep.subr.bf16.mxu0 %v242_v1 }
   0x6   :  { %133 = vmatpush1.bf16.msra.mxu0 %v205_v2 }
   0x7   :  { %134 = vmatprep.subr.bf16.mxu0 %v242_v1 }
   0xa   :  { %135 = vmatpush1.bf16.msra.mxu0 %v206_v3 }
   0xb   :  { %136 = vmatprep.subr.bf16.mxu0 %v242_v1 }
   0xc   :  { %8 = vsyncpa [#allocation3], 0  ;;  %v188_v6 = vcombine.high %v16_v5, %v16_v5  ;;  %v208_v7 = vld [vmem:[%s319_s1 + $0x20] sm:$0xff]   ;;  %v209_v8 = vld [vmem:[%s319_s1 + $0x28] sm:$0xff]   ;;  %v187_v15 = vcombine.low %v16_v5, %v16_v5  ;;  %s243_s12 = smov [#allocation2]  }
   0xd   :  { %v210_v9 = vld [vmem:[%s319_s1 + $0x30] sm:$0xff]   ;;  %v211_v10 = vld [vmem:[%s319_s1 + $0x38] sm:$0xff]   ;;  %v212_v11 = vld [vmem:[%s319_s1 + $0x40] sm:$0xff]   ;;  %s178_s13 = sshll.u32 %s243_s12, 4  ;;  %s179_s13 = int_to_ptr.vmem [resolvable:$true] %s178_s13 }
   0xe   :  { %137 = vmatpush1.bf16.msra.mxu0 %v207_v4  ;;  %201 = vmatprep.mubr.msk.bf16.mxu0 %vm126_vm0, %v188_v6  ;;  %v213_v12 = vld [vmem:[%s319_s1 + $0x48] sm:$0xff]   ;;  %v214_v13 = vld [vmem:[%s319_s1 + $0x50] sm:$0xff]   ;;  %v215_v14 = vld [vmem:[%s319_s1 + $0x58] sm:$0xff]   ;;  %s218_s14 = scalar_lea.vmem %s179_s13, 64  ;;  %p223_p1 = scmp.lt.s32.totalorder %s179_s13, %s179_s13 }
   0xf   :  { %138 = vmatprep.subr.bf16.mxu0 %v242_v1  ;;  %v186_v16 = vld [vmem:[%s320_s2] ss:$0 sm:$0xff]  ;;  %p219_p0 = scmp.ne.s32.totalorder %s179_s13, %s218_s14  ;;  %p224_p2 = scmp.lt.s32.totalorder %s218_s14, %s218_s14 }
  0x11   :  { %p225_p3 = por %p224_p2, %p223_p1 }
  0x12   :  { %139 = vmatpush1.bf16.msra.mxu0 %v208_v7 }
  0x13   :  { %140 = vmatprep.subr.bf16.mxu0 %v242_v1  ;;  %p226_p4 = pnand %p225_p3, %p219_p0 }
  0x16   :  { %141 = vmatpush1.bf16.msra.mxu0 %v209_v8 }
  0x17   :  { %142 = vmatprep.subr.bf16.mxu0 %v242_v1 }
  0x1a   :  { %143 = vmatpush1.bf16.msra.mxu0 %v210_v9 }
  0x1b   :  { %144 = vmatprep.subr.bf16.mxu0 %v242_v1 }
  0x1e   :  { %145 = vmatpush1.bf16.msra.mxu0 %v211_v10 }
  0x1f   :  { %146 = vmatprep.subr.bf16.mxu0 %v242_v1 }
  0x22   :  { %147 = vmatpush1.bf16.msra.mxu0 %v212_v11 }
  0x23   :  { %148 = vmatprep.subr.bf16.mxu0 %v242_v1 }
  0x26   :  { %149 = vmatpush1.bf16.msra.mxu0 %v213_v12 }
  0x27   :  { %150 = vmatprep.subr.bf16.mxu0 %v242_v1 }
  0x2a   :  { %151 = vmatpush1.bf16.msra.mxu0 %v214_v13 }
  0x2b   :  { %152 = vmatprep.subr.bf16.mxu0 %v242_v1 }
  0x2e   :  { %153 = vmatpush1.bf16.msra.mxu0 %v215_v14 }
  0x31   :  { %163 = vmatmul.mubr.bf16.vlgmr.msra.gmra.mrb[0].mxu0 %v187_v15 }
 0x104   :  { %v164_v17 = vpop.f32.mrb[0].mxu0 }
 0x105   :  { %v165_v18 = vadd.f32 %v186_v16, %v164_v17  ;;  %v166_v19 = vpop.f32.mrb[1].mxu0 }
 0x106   :  { %v167_v20 = vpop.f32.mrb[2].mxu0 }
 0x107   :  { %v170_v21 = vpack.c.bf16 %v165_v18, %v165_v18  ;;  %v168_v22 = vpop.f32.mrb[3].mxu0 }
 0x109   :  { %171 = vst [vmem:[#allocation2] sm:$0xf] %v170_v21 }
 0x10a   :  { %229 = shalt.err (!%p226_p4)
}
 0x10b   :  { %s230_s2 = scalar_lea.hbm %s321_s3, 64 }
 0x10c   :  { %p231_p5 = scmp.ne.s32.totalorder %s321_s3, %s230_s2  ;;  %p234_p6 = scmp.lt.u32.totalorder %s230_s2, %s321_s3 }
 0x10e   :  { %p236_p7 = pnand %p234_p6, %p231_p5 }
 0x110   :  { %239 = shalt.err (!%p236_p7)
}
 0x111   :  { %181 = dma.vmem_to_hbm [thread:$0]  %s179_s13, 64, %s321_s3, [#allocation3]  }
 0x112   :  { %240 = dma.done.wait [#allocation3], 64  }
 0x113   :  { %241 = vsyncadd [#allocation3], 4294967232 }
 0x114   :  { %185 = vsyncpa [#allocation3], 1 }

</bundles_post_ra>
